<compile_context>
chip_gen: v5e
topology: v5e:2x2
jax: 0.10.0
libtpu: 0.0.40
codegen_flags: <defaults>
</compile_context>

<pallas_src>
import functools

import numpy as np
import jax
import jax.numpy as jnp
from jax import lax
from jax.experimental import pallas as pl
from jax.experimental.pallas import tpu as pltpu

EPS = 1e-5
NEG_SLOPE = 0.01  # nn.LeakyReLU default


def _conv_block_kernel(x_ref, w_ref, b_ref, m_ref, o_ref, *, H, W, Cin, Cout):
    # x_ref: (1, Cin, H*W)   one batch element; channels on sublanes, spatial on lanes
    # w_ref: (9, Cout, Cin)  conv weights, tap-major (kh*3 + kw) -> clean leading-axis loads
    # b_ref: (Cout, 1)       bias
    # m_ref: (9, 1, H*W)     per-tap boundary masks (1 = valid, 0 = zero padding)
    # o_ref: (1, Cout, H*W)  lane-dense output block
    HW = H * W
    x = x_ref[0].astype(jnp.float32)  # (Cin, HW)

    # 3x3 conv as 9 (Cout, Cin) @ (Cin, HW) matmuls; spatial shifts via lane rotation.
    # NOTE: inputs kept f32 on the MXU (f32 accumulate) to stay inside the 1e-4 check;
    #       cast `xs` / `w_t` to bf16 here for ~2x MXU issue rate if tolerance allows.
    acc = jnp.zeros((Cout, HW), dtype=jnp.float32)
    for kh in range(3):
        for kw in range(3):
            t = kh * 3 + kw
            offset = (kh - 1) * W + (kw - 1)  # flat spatial shift of this tap
            if offset == 0:
                xs = x
            else:
                # shifted[p] = x[p + offset]; wrapped lanes are zeroed by the mask below
                xs = pltpu.roll(x, shift=(-offset) % HW, axis=1)
            if t != 4:  # center tap has no boundary
                xs = xs * m_ref[t]  # (1, HW) broadcast over Cin sublanes
            w_t = w_ref[t].astype(jnp.float32)  # (Cout, Cin)
            acc = acc + jnp.dot(w_t, xs, preferred_element_type=jnp.float32)

    acc = acc + b_ref[...].astype(jnp.float32)        # bias, (Cout, 1) lane-broadcast

    # LeakyReLU (negative_slope = 0.01)
    acc = jnp.where(acc > 0, acc, NEG_SLOPE * acc)

    # InstanceNorm2d (affine=False): per-(batch, channel) normalization over spatial,
    # i.e. a reduction over the lane axis in this layout.
    mean = jnp.mean(acc, axis=1, keepdims=True)                    # (Cout, 1)
    centered = acc - mean
    var = jnp.mean(centered * centered, axis=1, keepdims=True)     # biased variance
    y = centered * lax.rsqrt(var + EPS)

    o_ref[0] = y.astype(o_ref.dtype)


def _build_tap_masks(H, W):
    """Per-tap float masks over the flattened spatial axis: 1 where the shifted input
    position is inside the image (zero padding elsewhere)."""
    h = np.arange(H).reshape(H, 1)
    w = np.arange(W).reshape(1, W)
    masks = np.zeros((9, 1, H * W), dtype=np.float32)
    for kh in range(3):
        for kw in range(3):
            dh, dw = kh - 1, kw - 1
            valid = ((h + dh >= 0) & (h + dh < H) &
                     (w + dw >= 0) & (w + dw < W))
            masks[kh * 3 + kw, 0, :] = valid.reshape(-1).astype(np.float32)
    return masks


def conv_block_forward(x_nchw, weight, bias):
    """x_nchw: (N, Cin, H, W); weight: (Cout, Cin, 3, 3); bias: (Cout,). Returns (N, Cout, H, W)."""
    N, Cin, H, W = x_nchw.shape
    Cout = weight.shape[0]
    HW = H * W

    # All activation-side glue is free (contiguous reshapes); only the tiny weight/bias
    # constants get rearranged.
    x_flat = x_nchw.reshape(N, Cin, HW)
    w_taps = jnp.transpose(weight, (2, 3, 0, 1)).reshape(9, Cout, Cin)  # [t, co, ci]
    b_col = bias.reshape(Cout, 1)
    masks = jnp.asarray(_build_tap_masks(H, W))

    kernel = functools.partial(_conv_block_kernel, H=H, W=W, Cin=Cin, Cout=Cout)

    # TODO(synk): for large H/W/C (esp. v7x's 64 MiB VMEM) add an H-row-tile grid axis
    # with a two-pass InstanceNorm; at these sizes the whole plane fits comfortably.
    out_flat = pl.pallas_call(
        kernel,
        out_shape=jax.ShapeDtypeStruct((N, Cout, HW), x_nchw.dtype),
        grid_spec=pltpu.PrefetchScalarGridSpec(
            num_scalar_prefetch=0,
            grid=(N,),
            in_specs=[
                pl.BlockSpec((1, Cin, HW), lambda n: (n, 0, 0)),
                pl.BlockSpec((9, Cout, Cin), lambda n: (0, 0, 0)),
                pl.BlockSpec((Cout, 1), lambda n: (0, 0)),
                pl.BlockSpec((9, 1, HW), lambda n: (0, 0, 0)),
            ],
            out_specs=pl.BlockSpec((1, Cout, HW), lambda n: (n, 0, 0)),
        ),
        compiler_params=pltpu.CompilerParams(dimension_semantics=("parallel",)),
    )(x_flat, w_taps, b_col, masks)

    return out_flat.reshape(N, Cout, H, W)


def _reference(x_nchw, weight, bias):
    # Pure-JAX reference of the PyTorch module for validation.
    y = lax.conv_general_dilated(
        x_nchw.astype(jnp.float32), weight.astype(jnp.float32),
        window_strides=(1, 1), padding=((1, 1), (1, 1)),
        dimension_numbers=("NCHW", "OIHW", "NCHW"))
    y = y + bias.reshape(1, -1, 1, 1)
    y = jnp.where(y > 0, y, NEG_SLOPE * y)
    mean = jnp.mean(y, axis=(2, 3), keepdims=True)
    var = jnp.mean((y - mean) ** 2, axis=(2, 3), keepdims=True)
    return (y - mean) / jnp.sqrt(var + EPS)


if __name__ == "__main__":
    key = jax.random.PRNGKey(0)
    N, Cin, Cout, H, W = 2, 4, 8, 16, 16

    k_x, k_w, k_b = jax.random.split(key, 3)
    x = jax.random.normal(k_x, (N, Cin, H, W), dtype=jnp.float32)
    # Deterministic kaiming-uniform-like init (matches Conv2d default bound structure).
    fan_in = Cin * 3 * 3
    bound_w = (6.0 / fan_in) ** 0.5
    weight = jax.random.uniform(k_w, (Cout, Cin, 3, 3), jnp.float32, -bound_w, bound_w)
    bound_b = 1.0 / (fan_in ** 0.5)
    bias = jax.random.uniform(k_b, (Cout,), jnp.float32, -bound_b, bound_b)

    out = conv_block_forward(x, weight, bias)
    out = jax.block_until_ready(out)

    ref = _reference(x, weight, bias)
    assert out.shape == (N, Cout, H, W)
    assert jnp.allclose(out, ref, atol=1e-4, rtol=1e-4)

    print("KERNEL_OK")
</pallas_src>

<mosaic_0001>
module attributes {stable_mosaic.version = 11 : i64} {
  func.func @_conv_block_kernel(%arg0: i32, %arg1: memref<1x4x256xf32, #tpu.memory_space<vmem>>, %arg2: memref<9x8x4xf32, #tpu.memory_space<vmem>>, %arg3: memref<8x1xf32, #tpu.memory_space<vmem>>, %arg4: memref<9x1x256xf32, #tpu.memory_space<vmem>>, %arg5: memref<1x8x256xf32, #tpu.memory_space<vmem>>) attributes {dimension_semantics = [#tpu.dimension_semantics<parallel>], iteration_bounds = array<i64: 2>, scalar_prefetch = 0 : i64, scratch_operands = 0 : i64, tpu.core_type = #tpu.core_type<tc>, window_params = [{transform_indices = @transform_0, window_bounds = array<i64: 1, 4, 256>}, {pipeline_mode = #tpu.pipeline_mode<synchronous>, transform_indices = @transform_1, window_bounds = array<i64: 9, 8, 4>}, {pipeline_mode = #tpu.pipeline_mode<synchronous>, transform_indices = @transform_2, window_bounds = array<i64: 8, 1>}, {pipeline_mode = #tpu.pipeline_mode<synchronous>, transform_indices = @transform_3, window_bounds = array<i64: 9, 1, 256>}, {transform_indices = @transform_4, window_bounds = array<i64: 1, 8, 256>}]} {
    %c0 = arith.constant 0 : index
    %c0_0 = arith.constant 0 : index
    %c0_1 = arith.constant 0 : index
    %0 = vector.load %arg1[%c0, %c0_0, %c0_1] : memref<1x4x256xf32, #tpu.memory_space<vmem>>, vector<1x4x256xf32>
    %1 = vector.shape_cast %0 : vector<1x4x256xf32> to vector<4x256xf32>
    %cst = arith.constant 0.000000e+00 : f32
    %2 = vector.broadcast %cst : f32 to vector<8x256xf32>
    %c17_i32 = arith.constant 17 : i32
    %3 = tpu.dynamic_rotate %1 by %c17_i32 dim 1 : vector<4x256xf32>, i32 -> vector<4x256xf32>
    %c0_2 = arith.constant 0 : index
    %c0_3 = arith.constant 0 : index
    %c0_4 = arith.constant 0 : index
    %4 = vector.load %arg4[%c0_2, %c0_3, %c0_4] : memref<9x1x256xf32, #tpu.memory_space<vmem>>, vector<1x1x256xf32>
    %5 = vector.shape_cast %4 : vector<1x1x256xf32> to vector<1x256xf32>
    %6 = vector.broadcast %5 : vector<1x256xf32> to vector<4x256xf32>
    %7 = arith.mulf %3, %6 : vector<4x256xf32>
    %c0_5 = arith.constant 0 : index
    %c0_6 = arith.constant 0 : index
    %c0_7 = arith.constant 0 : index
    %8 = vector.load %arg2[%c0_5, %c0_6, %c0_7] : memref<9x8x4xf32, #tpu.memory_space<vmem>>, vector<1x8x4xf32>
    %9 = vector.shape_cast %8 : vector<1x8x4xf32> to vector<8x4xf32>
    %cst_8 = arith.constant dense<0.000000e+00> : vector<8x256xf32>
    %10 = tpu.matmul %9, %7, %cst_8 {dimension_numbers = #tpu.dot_dimension_numbers<[1], [0], [0], [1], [0, 0, 1, 1], [], []>} : vector<8x4xf32>, vector<4x256xf32>, vector<8x256xf32> -> vector<8x256xf32>
    %11 = arith.addf %2, %10 : vector<8x256xf32>
    %c16_i32 = arith.constant 16 : i32
    %12 = tpu.dynamic_rotate %1 by %c16_i32 dim 1 : vector<4x256xf32>, i32 -> vector<4x256xf32>
    %c1 = arith.constant 1 : index
    %c0_9 = arith.constant 0 : index
    %c0_10 = arith.constant 0 : index
    %13 = vector.load %arg4[%c1, %c0_9, %c0_10] : memref<9x1x256xf32, #tpu.memory_space<vmem>>, vector<1x1x256xf32>
    %14 = vector.shape_cast %13 : vector<1x1x256xf32> to vector<1x256xf32>
    %15 = vector.broadcast %14 : vector<1x256xf32> to vector<4x256xf32>
    %16 = arith.mulf %12, %15 : vector<4x256xf32>
    %c1_11 = arith.constant 1 : index
    %c0_12 = arith.constant 0 : index
    %c0_13 = arith.constant 0 : index
    %17 = vector.load %arg2[%c1_11, %c0_12, %c0_13] : memref<9x8x4xf32, #tpu.memory_space<vmem>>, vector<1x8x4xf32>
    %18 = vector.shape_cast %17 : vector<1x8x4xf32> to vector<8x4xf32>
    %cst_14 = arith.constant dense<0.000000e+00> : vector<8x256xf32>
    %19 = tpu.matmul %18, %16, %cst_14 {dimension_numbers = #tpu.dot_dimension_numbers<[1], [0], [0], [1], [0, 0, 1, 1], [], []>} : vector<8x4xf32>, vector<4x256xf32>, vector<8x256xf32> -> vector<8x256xf32>
    %20 = arith.addf %11, %19 : vector<8x256xf32>
    %c15_i32 = arith.constant 15 : i32
    %21 = tpu.dynamic_rotate %1 by %c15_i32 dim 1 : vector<4x256xf32>, i32 -> vector<4x256xf32>
    %c2 = arith.constant 2 : index
    %c0_15 = arith.constant 0 : index
    %c0_16 = arith.constant 0 : index
    %22 = vector.load %arg4[%c2, %c0_15, %c0_16] : memref<9x1x256xf32, #tpu.memory_space<vmem>>, vector<1x1x256xf32>
    %23 = vector.shape_cast %22 : vector<1x1x256xf32> to vector<1x256xf32>
    %24 = vector.broadcast %23 : vector<1x256xf32> to vector<4x256xf32>
    %25 = arith.mulf %21, %24 : vector<4x256xf32>
    %c2_17 = arith.constant 2 : index
    %c0_18 = arith.constant 0 : index
    %c0_19 = arith.constant 0 : index
    %26 = vector.load %arg2[%c2_17, %c0_18, %c0_19] : memref<9x8x4xf32, #tpu.memory_space<vmem>>, vector<1x8x4xf32>
    %27 = vector.shape_cast %26 : vector<1x8x4xf32> to vector<8x4xf32>
    %cst_20 = arith.constant dense<0.000000e+00> : vector<8x256xf32>
    %28 = tpu.matmul %27, %25, %cst_20 {dimension_numbers = #tpu.dot_dimension_numbers<[1], [0], [0], [1], [0, 0, 1, 1], [], []>} : vector<8x4xf32>, vector<4x256xf32>, vector<8x256xf32> -> vector<8x256xf32>
    %29 = arith.addf %20, %28 : vector<8x256xf32>
    %c1_i32 = arith.constant 1 : i32
    %30 = tpu.dynamic_rotate %1 by %c1_i32 dim 1 : vector<4x256xf32>, i32 -> vector<4x256xf32>
    %c3 = arith.constant 3 : index
    %c0_21 = arith.constant 0 : index
    %c0_22 = arith.constant 0 : index
    %31 = vector.load %arg4[%c3, %c0_21, %c0_22] : memref<9x1x256xf32, #tpu.memory_space<vmem>>, vector<1x1x256xf32>
    %32 = vector.shape_cast %31 : vector<1x1x256xf32> to vector<1x256xf32>
    %33 = vector.broadcast %32 : vector<1x256xf32> to vector<4x256xf32>
    %34 = arith.mulf %30, %33 : vector<4x256xf32>
    %c3_23 = arith.constant 3 : index
    %c0_24 = arith.constant 0 : index
    %c0_25 = arith.constant 0 : index
    %35 = vector.load %arg2[%c3_23, %c0_24, %c0_25] : memref<9x8x4xf32, #tpu.memory_space<vmem>>, vector<1x8x4xf32>
    %36 = vector.shape_cast %35 : vector<1x8x4xf32> to vector<8x4xf32>
    %cst_26 = arith.constant dense<0.000000e+00> : vector<8x256xf32>
    %37 = tpu.matmul %36, %34, %cst_26 {dimension_numbers = #tpu.dot_dimension_numbers<[1], [0], [0], [1], [0, 0, 1, 1], [], []>} : vector<8x4xf32>, vector<4x256xf32>, vector<8x256xf32> -> vector<8x256xf32>
    %38 = arith.addf %29, %37 : vector<8x256xf32>
    %c4 = arith.constant 4 : index
    %c0_27 = arith.constant 0 : index
    %c0_28 = arith.constant 0 : index
    %39 = vector.load %arg2[%c4, %c0_27, %c0_28] : memref<9x8x4xf32, #tpu.memory_space<vmem>>, vector<1x8x4xf32>
    %40 = vector.shape_cast %39 : vector<1x8x4xf32> to vector<8x4xf32>
    %cst_29 = arith.constant dense<0.000000e+00> : vector<8x256xf32>
    %41 = tpu.matmul %40, %1, %cst_29 {dimension_numbers = #tpu.dot_dimension_numbers<[1], [0], [0], [1], [0, 0, 1, 1], [], []>} : vector<8x4xf32>, vector<4x256xf32>, vector<8x256xf32> -> vector<8x256xf32>
    %42 = arith.addf %38, %41 : vector<8x256xf32>
    %c255_i32 = arith.constant 255 : i32
    %43 = tpu.dynamic_rotate %1 by %c255_i32 dim 1 : vector<4x256xf32>, i32 -> vector<4x256xf32>
    %c5 = arith.constant 5 : index
    %c0_30 = arith.constant 0 : index
    %c0_31 = arith.constant 0 : index
    %44 = vector.load %arg4[%c5, %c0_30, %c0_31] : memref<9x1x256xf32, #tpu.memory_space<vmem>>, vector<1x1x256xf32>
    %45 = vector.shape_cast %44 : vector<1x1x256xf32> to vector<1x256xf32>
    %46 = vector.broadcast %45 : vector<1x256xf32> to vector<4x256xf32>
    %47 = arith.mulf %43, %46 : vector<4x256xf32>
    %c5_32 = arith.constant 5 : index
    %c0_33 = arith.constant 0 : index
    %c0_34 = arith.constant 0 : index
    %48 = vector.load %arg2[%c5_32, %c0_33, %c0_34] : memref<9x8x4xf32, #tpu.memory_space<vmem>>, vector<1x8x4xf32>
    %49 = vector.shape_cast %48 : vector<1x8x4xf32> to vector<8x4xf32>
    %cst_35 = arith.constant dense<0.000000e+00> : vector<8x256xf32>
    %50 = tpu.matmul %49, %47, %cst_35 {dimension_numbers = #tpu.dot_dimension_numbers<[1], [0], [0], [1], [0, 0, 1, 1], [], []>} : vector<8x4xf32>, vector<4x256xf32>, vector<8x256xf32> -> vector<8x256xf32>
    %51 = arith.addf %42, %50 : vector<8x256xf32>
    %c241_i32 = arith.constant 241 : i32
    %52 = tpu.dynamic_rotate %1 by %c241_i32 dim 1 : vector<4x256xf32>, i32 -> vector<4x256xf32>
    %c6 = arith.constant 6 : index
    %c0_36 = arith.constant 0 : index
    %c0_37 = arith.constant 0 : index
    %53 = vector.load %arg4[%c6, %c0_36, %c0_37] : memref<9x1x256xf32, #tpu.memory_space<vmem>>, vector<1x1x256xf32>
    %54 = vector.shape_cast %53 : vector<1x1x256xf32> to vector<1x256xf32>
    %55 = vector.broadcast %54 : vector<1x256xf32> to vector<4x256xf32>
    %56 = arith.mulf %52, %55 : vector<4x256xf32>
    %c6_38 = arith.constant 6 : index
    %c0_39 = arith.constant 0 : index
    %c0_40 = arith.constant 0 : index
    %57 = vector.load %arg2[%c6_38, %c0_39, %c0_40] : memref<9x8x4xf32, #tpu.memory_space<vmem>>, vector<1x8x4xf32>
    %58 = vector.shape_cast %57 : vector<1x8x4xf32> to vector<8x4xf32>
    %cst_41 = arith.constant dense<0.000000e+00> : vector<8x256xf32>
    %59 = tpu.matmul %58, %56, %cst_41 {dimension_numbers = #tpu.dot_dimension_numbers<[1], [0], [0], [1], [0, 0, 1, 1], [], []>} : vector<8x4xf32>, vector<4x256xf32>, vector<8x256xf32> -> vector<8x256xf32>
    %60 = arith.addf %51, %59 : vector<8x256xf32>
    %c240_i32 = arith.constant 240 : i32
    %61 = tpu.dynamic_rotate %1 by %c240_i32 dim 1 : vector<4x256xf32>, i32 -> vector<4x256xf32>
    %c7 = arith.constant 7 : index
    %c0_42 = arith.constant 0 : index
    %c0_43 = arith.constant 0 : index
    %62 = vector.load %arg4[%c7, %c0_42, %c0_43] : memref<9x1x256xf32, #tpu.memory_space<vmem>>, vector<1x1x256xf32>
    %63 = vector.shape_cast %62 : vector<1x1x256xf32> to vector<1x256xf32>
    %64 = vector.broadcast %63 : vector<1x256xf32> to vector<4x256xf32>
    %65 = arith.mulf %61, %64 : vector<4x256xf32>
    %c7_44 = arith.constant 7 : index
    %c0_45 = arith.constant 0 : index
    %c0_46 = arith.constant 0 : index
    %66 = vector.load %arg2[%c7_44, %c0_45, %c0_46] : memref<9x8x4xf32, #tpu.memory_space<vmem>>, vector<1x8x4xf32>
    %67 = vector.shape_cast %66 : vector<1x8x4xf32> to vector<8x4xf32>
    %cst_47 = arith.constant dense<0.000000e+00> : vector<8x256xf32>
    %68 = tpu.matmul %67, %65, %cst_47 {dimension_numbers = #tpu.dot_dimension_numbers<[1], [0], [0], [1], [0, 0, 1, 1], [], []>} : vector<8x4xf32>, vector<4x256xf32>, vector<8x256xf32> -> vector<8x256xf32>
    %69 = arith.addf %60, %68 : vector<8x256xf32>
    %c239_i32 = arith.constant 239 : i32
    %70 = tpu.dynamic_rotate %1 by %c239_i32 dim 1 : vector<4x256xf32>, i32 -> vector<4x256xf32>
    %c8 = arith.constant 8 : index
    %c0_48 = arith.constant 0 : index
    %c0_49 = arith.constant 0 : index
    %71 = vector.load %arg4[%c8, %c0_48, %c0_49] : memref<9x1x256xf32, #tpu.memory_space<vmem>>, vector<1x1x256xf32>
    %72 = vector.shape_cast %71 : vector<1x1x256xf32> to vector<1x256xf32>
    %73 = vector.broadcast %72 : vector<1x256xf32> to vector<4x256xf32>
    %74 = arith.mulf %70, %73 : vector<4x256xf32>
    %c8_50 = arith.constant 8 : index
    %c0_51 = arith.constant 0 : index
    %c0_52 = arith.constant 0 : index
    %75 = vector.load %arg2[%c8_50, %c0_51, %c0_52] : memref<9x8x4xf32, #tpu.memory_space<vmem>>, vector<1x8x4xf32>
    %76 = vector.shape_cast %75 : vector<1x8x4xf32> to vector<8x4xf32>
    %cst_53 = arith.constant dense<0.000000e+00> : vector<8x256xf32>
    %77 = tpu.matmul %76, %74, %cst_53 {dimension_numbers = #tpu.dot_dimension_numbers<[1], [0], [0], [1], [0, 0, 1, 1], [], []>} : vector<8x4xf32>, vector<4x256xf32>, vector<8x256xf32> -> vector<8x256xf32>
    %78 = arith.addf %69, %77 : vector<8x256xf32>
    %c0_54 = arith.constant 0 : index
    %c0_55 = arith.constant 0 : index
    %79 = vector.load %arg3[%c0_54, %c0_55] : memref<8x1xf32, #tpu.memory_space<vmem>>, vector<8x1xf32>
    %80 = vector.broadcast %79 : vector<8x1xf32> to vector<8x256xf32>
    %81 = arith.addf %78, %80 : vector<8x256xf32>
    %cst_56 = arith.constant 0.000000e+00 : f32
    %82 = vector.broadcast %cst_56 : f32 to vector<8x256xf32>
    %83 = arith.cmpf ogt, %81, %82 : vector<8x256xf32>
    %cst_57 = arith.constant 0.00999999977 : f32
    %84 = vector.broadcast %cst_57 : f32 to vector<8x256xf32>
    %85 = arith.mulf %84, %81 : vector<8x256xf32>
    %86 = arith.select %83, %81, %85 : vector<8x256xi1>, vector<8x256xf32>
    %cst_58 = arith.constant dense<0.000000e+00> : vector<8xf32>
    %87 = vector.multi_reduction <add>, %86, %cst_58 [1] : vector<8x256xf32> to vector<8xf32>
    %88 = vector.shape_cast %87 : vector<8xf32> to vector<8x1xf32>
    %cst_59 = arith.constant 2.560000e+02 : f32
    %89 = vector.broadcast %cst_59 : f32 to vector<8x1xf32>
    %90 = arith.divf %88, %89 : vector<8x1xf32>
    %91 = vector.broadcast %90 : vector<8x1xf32> to vector<8x256xf32>
    %92 = arith.subf %86, %91 : vector<8x256xf32>
    %93 = arith.mulf %92, %92 : vector<8x256xf32>
    %cst_60 = arith.constant dense<0.000000e+00> : vector<8xf32>
    %94 = vector.multi_reduction <add>, %93, %cst_60 [1] : vector<8x256xf32> to vector<8xf32>
    %95 = vector.shape_cast %94 : vector<8xf32> to vector<8x1xf32>
    %cst_61 = arith.constant 2.560000e+02 : f32
    %96 = vector.broadcast %cst_61 : f32 to vector<8x1xf32>
    %97 = arith.divf %95, %96 : vector<8x1xf32>
    %cst_62 = arith.constant 9.99999974E-6 : f32
    %98 = vector.broadcast %cst_62 : f32 to vector<8x1xf32>
    %99 = arith.addf %97, %98 : vector<8x1xf32>
    %100 = math.rsqrt %99 : vector<8x1xf32>
    %101 = vector.broadcast %100 : vector<8x1xf32> to vector<8x256xf32>
    %102 = arith.mulf %92, %101 : vector<8x256xf32>
    %c0_63 = arith.constant 0 : index
    %c0_64 = arith.constant 0 : index
    %c0_65 = arith.constant 0 : index
    %103 = vector.load %arg5[%c0_63, %c0_64, %c0_65] : memref<1x8x256xf32, #tpu.memory_space<vmem>>, vector<1x8x256xf32>
    %104 = vector.shape_cast %103 : vector<1x8x256xf32> to vector<8x256xf32>
    %105 = vector.shape_cast %102 : vector<8x256xf32> to vector<1x8x256xf32>
    tpu.vector_store %arg5[%c0_63, %c0_64, %c0_65], %105 {strides = array<i32>} : memref<1x8x256xf32, #tpu.memory_space<vmem>>, vector<1x8x256xf32>,
    return
  }
  func.func @transform_0(%arg0: i32) -> (i32, i32, i32) {
    %c0_i32 = arith.constant 0 : i32
    %c0_i32_0 = arith.constant 0 : i32
    %c0_i32_1 = arith.constant 0 : i32
    return %arg0, %c0_i32, %c0_i32_0 : i32, i32, i32
  }
  func.func @transform_1(%arg0: i32) -> (i32, i32, i32) {
    %c0_i32 = arith.constant 0 : i32
    %c0_i32_0 = arith.constant 0 : i32
    %c0_i32_1 = arith.constant 0 : i32
    %c0_i32_2 = arith.constant 0 : i32
    return %c0_i32, %c0_i32_0, %c0_i32_1 : i32, i32, i32
  }
  func.func @transform_2(%arg0: i32) -> (i32, i32) {
    %c0_i32 = arith.constant 0 : i32
    %c0_i32_0 = arith.constant 0 : i32
    %c0_i32_1 = arith.constant 0 : i32
    return %c0_i32, %c0_i32_0 : i32, i32
  }
  func.func @transform_3(%arg0: i32) -> (i32, i32, i32) {
    %c0_i32 = arith.constant 0 : i32
    %c0_i32_0 = arith.constant 0 : i32
    %c0_i32_1 = arith.constant 0 : i32
    %c0_i32_2 = arith.constant 0 : i32
    return %c0_i32, %c0_i32_0, %c0_i32_1 : i32, i32, i32
  }
  func.func @transform_4(%arg0: i32) -> (i32, i32, i32) {
    %c0_i32 = arith.constant 0 : i32
    %c0_i32_0 = arith.constant 0 : i32
    %c0_i32_1 = arith.constant 0 : i32
    return %arg0, %c0_i32, %c0_i32_0 : i32, i32, i32
  }
}

</mosaic_0001>

<bundles_post_ra>
// kernel: tpu_custom_call.1
= control target key start
LH: loop header
LB: loop body
LE: loop exit
PB: predicated region body
PF: predicated region fallthrough
CT: control target
= control target key end

     0   :  { %9 = vsyncpa [#allocation3], 0  ;;  %s1376_s0 = inlined_call_operand.vmem [shape: f32[2,4,256], index: 0, kind: input, shape index: {}]   ;;  %s1377_s1 = inlined_call_operand.vmem [shape: f32[9,8,4], index: 1, kind: input, shape index: {}]   ;;  %s1378_s2 = inlined_call_operand.vmem [shape: f32[8,1], index: 2, kind: input, shape index: {}]   ;;  %s1379_s3 = inlined_call_operand.vmem [shape: f32[9,1,256], index: 3, kind: input, shape index: {}]   ;;  %s1380_s4 = inlined_call_operand.hbm [shape: f32[2,8,256], index: 4, kind: output, shape index: {}]  }
   0x1   :  { %11 = vsyncpa [#allocation3 + $0x1], 0  ;;  %s1185_s15 = smov 0   ;;  %s1187_s16 = smov 0  }
   0x2   :  { %s1189_s17 = smov 0   ;;  %s1191_s18 = smov 0  }
   0x3 LB: > { %s1206_s19 = sadd.s32 4294967295, %s1148_s18   ;;  %s966_s20 = sadd.s32 4294967294, %s1148_s18   ;;  %s1148_s18 = sphi %s1191_s18, %s1386_s18   ;;  %s1144_s17 = sphi %s1189_s17, %s1385_s17   ;;  %s1140_s16 = sphi %s1187_s16, %s1384_s16   ;;  %s1136_s15 = sphi %s1185_s15, %s1383_s15  }
   0x4   : > { %s1210_s21 = sadd.s32 1, %s1148_s18   ;;  %s113_s22 = sadd.s32 1, %s1144_s17 }
   0x5   : > { %s110_s23 = ssub.s32 %s1148_s18, %s1210_s21  ;;  %p123_p0 = scmp.ne.s32.totalorder %s1144_s17, %s1140_s16 }
   0x6   : > { %p111_p1 = scmp.eq.s32.totalorder %s110_s23, 0  ;;  %p124_p2 = scmp.eq.s32.totalorder %s1206_s19, 1 }
   0x7   : > { %p129_p3 = scmp.ne.s32.totalorder %s1140_s16, %s1136_s15  ;;  %p130_p4 = scmp.eq.s32.totalorder %s966_s20, 1 }
   0x8   : > { %s1221_s24 = scalar_select %p111_p1, %s1144_s17, %s113_s22  }
   0x9   : > { %p1223_p5 = por %p124_p2, %p123_p0  ;;  %p1227_p6 = por %p130_p4, %p129_p3 }
   0xa   : > { %p969_p7 = scmp.ge.s32.totalorder %s1148_s18, 1  ;;  %p165_p8 = scmp.lt.s32.totalorder %s1148_s18, 3 }
   0xc   : > { %p166_p9 = pnand %p969_p7, %p165_p8 }
   0xd   : > { %p191_p10 = scmp.lt.s32.totalorder (!%p166_p9), %s1206_s19, 1  ;;  %s1150_s6 = smov (!%p166_p9), 17  }
   0xe   : > { %169 = sbr.rel (%p166_p9) target bundleno = 618 (0x26a), region = 36  ;;  %s1151_s7 = smov (!%p166_p9), 16  }
   0xf   : > { %s1152_s8 = smov (!%p166_p9), 15   ;;  %s1153_s9 = smov (!%p166_p9), 1  }
  0x10   : > { %s1154_s10 = smov (!%p166_p9), 127   ;;  %s1155_s11 = smov (!%p166_p9), 113  }
  0x11   : > { %s1156_s12 = smov (!%p166_p9), 112   ;;  %s1157_s13 = smov (!%p166_p9), 111  }
  0x12   : > { %s188_s22 = sand.u32 (!%p166_p9), 1, %s1140_s16  }
  0x13   : > { %s192_s27 = scalar_select %p191_p10, %s1206_s19, 1  ;;  %v207_v19 = vlaneseq  ;;  %v212_v23 = vld [vmem:[%s1379_s3] sm:$0x3]  ;;  %vm248_vm1 = vcmask 1043456   ;;  %vm244_vm2 = vcmask 31744   ;;  %v974_v47 = vld [vmem:[%s1377_s1 + $0x8] sm:$0xff] }
  0x14   : > { %v214_v24 = vperm.slane %v212_v23, 0  ;;  %v215_v25 = vperm.slane %v212_v23, 1  ;;  %v220_v32 = vld [vmem:[%s1377_s1] sm:$0xff]  ;;  %v984_v59 = vld [vmem:[%s1377_s1 + $0x10] sm:$0xff]  ;;  %v990_v60 = vld [vmem:[%s1377_s1 + $0x18] sm:$0xff]  ;;  %s970_s23 = sshll.u32 %s188_s22, 4 }
  0x15   : > { %s1029_s28 = sshll.u32 %s192_s27, 3  ;;  %v1242_v21 = vand.u32 127, %v207_v19  ;;  %v973_v33 = vld [vmem:[%s1379_s3 + $0x2] sm:$0x3]  ;;  %v983_v34 = vld [vmem:[%s1379_s3 + $0x4] sm:$0x3] }
  0x16   : > { %s195_s5 = scalar_lea.vmem %s1376_s0, %s1029_s28  ;;  %v236_v36 = vperm.slane %v973_v33, 0  ;;  %v237_v37 = vperm.slane %v973_v33, 1  ;;  %v359_v38 = vperm.slane %v983_v34, 0  ;;  %v360_v39 = vperm.slane %v983_v34, 1  ;;  %v989_v50 = vld [vmem:[%s1379_s3 + $0x6] sm:$0x3] }
  0x17   : > { %v196_v0 = vld [vmem:[%s195_s5] sm:$0xff]  ;;  %vm209_vm0 = vcmp.lt.s32.totalorder %v1242_v21, 17  ;;  %vm353_vm3 = vcmp.lt.s32.totalorder %v1242_v21, 15  ;;  %vm230_vm4 = vcmp.lt.s32.totalorder %v1242_v21, 16  ;;  %vm427_vm5 = vcmp.lt.s32.totalorder %v1242_v21, 1  ;;  %v1007_v19 = vld [vmem:[%s1377_s1 + $0x30] sm:$0xff] }
  0x18   : > { %198 = vst [vmem:[#allocation1] ss:$2 sm:$0xff] %v196_v0  ;;  %v433_v51 = vperm.slane %v989_v50, 0  ;;  %v434_v52 = vperm.slane %v989_v50, 1  ;;  %v995_v61 = vld [vmem:[%s1377_s1 + $0x20] sm:$0xff]  ;;  %vm555_vm6 = vcmp.lt.s32.totalorder %v1242_v21, 127 }
  0x19   : > { %v1000_v62 = vld [vmem:[%s1379_s3 + $0xa] sm:$0x3]  ;;  %vm629_vm7 = vcmp.lt.s32.totalorder %v1242_v21, 113  ;;  %vm703_vm8 = vcmp.lt.s32.totalorder %v1242_v21, 112  ;;  %vm777_vm9 = vcmp.lt.s32.totalorder %v1242_v21, 111  ;;  %s1030_s27 = sshll.u32 %s1206_s19, 4 }
  0x1a   : > { %s902_s30 = scalar_lea.hbm %s1380_s4, %s1030_s27  ;;  %s190_s5 = scalar_lea.vmem [#allocation2], %s970_s23 }
  0x1b   : > { %s891_s19 = scalar_lea.sflag [#allocation3], %s188_s22 }
  0x1f   : > { %v199_v1 = vld.sshfl [vmem:[#allocation1] sm:$0xff pattern:$0x75316420]  ;;  %v200_v2 = vld.sshfl [vmem:[#allocation1 + $0x8] sm:$0xff pattern:$0x75316420] }
  0x20   : > { %203 = vrot.lane.b32.xlu0 %v199_v1, %s1150_s6  ;;  %221 = vst [vmem:[#allocation1] ss:$2 sm:$0xff] %v196_v0  ;;  %v561_v1 = vperm.slane %v1000_v62, 0 }
  0x27   : > { %v222_v3 = vld.sshfl [vmem:[#allocation1] sm:$0xff pattern:$0x75316420]  ;;  %v223_v4 = vld.sshfl [vmem:[#allocation1 + $0x8] sm:$0xff pattern:$0x75316420] }
  0x28   : > { %226 = vrot.lane.b32.xlu1 %v222_v3, %s1151_s7  ;;  %205 = vrot.lane.b32.xlu0 %v200_v2, %s1150_s6  ;;  %344 = vst [vmem:[#allocation1] ss:$2 sm:$0xff] %v196_v0  ;;  %v562_v2 = vperm.slane %v1000_v62, 1  ;;  %v1158_v3 = vmov 0   ;;  %s904_s6 = sshll.u32 %s190_s5, 4  ;;  %s905_s6 = int_to_ptr.vmem [resolvable:$true] %s904_s6 }
  0x29   : > { %1080 = vset.pattern.permute.xlu1 %v1158_v3  ;;  %1081 = vset.pattern.permute.xlu0 %v1158_v3 }
  0x2f   : > { %v345_v5 = vld.sshfl [vmem:[#allocation1] sm:$0xff pattern:$0x75316420]  ;;  %v346_v6 = vld.sshfl [vmem:[#allocation1 + $0x8] sm:$0xff pattern:$0x75316420] }
  0x30   : > { %228 = vrot.lane.b32.xlu1 %v223_v4, %s1151_s7  ;;  %418 = vst [vmem:[#allocation1] ss:$2 sm:$0xff] %v196_v0  ;;  %349 = vrot.lane.b32.xlu2 %v345_v5, %s1152_s8  ;;  %s906_s7 = sshll.u32 %s902_s30, 4  ;;  %s907_s7 = int_to_ptr.hbm [resolvable:$true] %s906_s7 }
  0x37   : > { %v420_v7 = vld.sshfl [vmem:[#allocation1 + $0x8] sm:$0xff pattern:$0x75316420]  ;;  %v419_v8 = vld.sshfl [vmem:[#allocation1] sm:$0xff pattern:$0x75316420] }
  0x38   : > { %425 = vrot.lane.b32.xlu1 %v420_v7, %s1153_s9  ;;  %423 = vrot.lane.b32.xlu0 %v419_v8, %s1153_s9  ;;  %494 = vst [vmem:[#allocation1] ss:$2 sm:$0xff] %v196_v0 }
  0x39   : > { %351 = vrot.lane.b32.xlu2 %v346_v6, %s1152_s8  ;;  %s1100_s8 = sshra.s32 %s907_s7, 4  ;;  %s1101_s8 = int_to_ptr.hbm [resolvable:$true] %s1100_s8 }
  0x3a   : > { %s1102_s9 = scalar_lea.hbm %s1101_s8, 16  ;;  %p1107_p0 = scmp.lt.s32.totalorder %s1101_s8, %s1380_s4 }
  0x3b   : > { %p1103_p11 = scmp.ne.s32.totalorder %s1101_s8, %s1102_s9 }
  0x3d   : > { %p1104_p12 = pnand %p1103_p11, %p1223_p5 }
  0x3f   : > { %v1238_v9 = vld.sshfl [vmem:[#allocation1] sm:$0xff pattern:$0x75316420]  ;;  %v1240_v10 = vld.sshfl [vmem:[#allocation1 + $0x8] sm:$0xff pattern:$0x75316420]  ;;  %p1105_p13 = pneg %p1104_p12 }
  0x40   : > { %546 = vst [vmem:[#allocation1] ss:$2 sm:$0xff] %v196_v0 }
  0x47   : > { %v548_v11 = vld.sshfl [vmem:[#allocation1 + $0x8] sm:$0xff pattern:$0x75316420]  ;;  %v547_v12 = vld.sshfl [vmem:[#allocation1] sm:$0xff pattern:$0x75316420] }
  0x48   : > { %553 = vrot.lane.b32.xlu0 %v548_v11, %s1154_s10  ;;  %620 = vst [vmem:[#allocation1] ss:$2 sm:$0xff] %v196_v0  ;;  %551 = vrot.lane.b32.xlu2 %v547_v12, %s1154_s10 }
  0x4f   : > { %v621_v13 = vld.sshfl [vmem:[#allocation1] sm:$0xff pattern:$0x75316420]  ;;  %v622_v14 = vld.sshfl [vmem:[#allocation1 + $0x8] sm:$0xff pattern:$0x75316420] }
  0x50   : > { %625 = vrot.lane.b32.xlu1 %v621_v13, %s1155_s11  ;;  %694 = vst [vmem:[#allocation1] ss:$2 sm:$0xff] %v196_v0  ;;  %627 = vrot.lane.b32.xlu2 %v622_v14, %s1155_s11 }
  0x57   : > { %v696_v15 = vld.sshfl [vmem:[#allocation1 + $0x8] sm:$0xff pattern:$0x75316420]  ;;  %v695_v16 = vld.sshfl [vmem:[#allocation1] sm:$0xff pattern:$0x75316420] }
  0x58   : > { %701 = vrot.lane.b32.xlu1 %v696_v15, %s1156_s12  ;;  %699 = vrot.lane.b32.xlu0 %v695_v16, %s1156_s12  ;;  %768 = vst [vmem:[#allocation1] ss:$2 sm:$0xff] %v196_v0  ;;  %v842_v0 = vld [vmem:[%s1378_s2] sm:$0xff]  ;;  %s1106_s12 = scalar_lea.hbm %s1380_s4, 32 }
  0x59   : > { %p1108_p1 = scmp.lt.s32.totalorder %s1106_s12, %s1102_s9 }
  0x5b   : > { %p1109_p2 = por %p1108_p1, %p1107_p0 }
  0x5d   : > { %p1110_p3 = pnand %p1109_p2, %p1105_p13 }
  0x5f   : > { %v770_v17 = vld.sshfl [vmem:[#allocation1 + $0x8] sm:$0xff pattern:$0x75316420]  ;;  %v769_v18 = vld.sshfl [vmem:[#allocation1] sm:$0xff pattern:$0x75316420] }
  0x60   : > { %775 = vrot.lane.b32.xlu0 %v770_v17, %s1157_s13  ;;  %773 = vrot.lane.b32.xlu2 %v769_v18, %s1157_s13 }
  0x61   : > { %845 = vperm.xlu1 %1080, %v842_v0  }
  0x8a   : > { %v350_v22 = vpop.permute.xlu2 %349 }
  0x92   : > { %v204_v20 = vpop.permute.xlu0 %203 }
  0x93   : > { %v352_v35 = vpop.permute.xlu2 %351 }
  0x94   : > { %v354_v40 = vsel %vm353_vm3, %v350_v22, %v352_v35  ;;  %v355_v41 = vsel %vm353_vm3, %v352_v35, %v350_v22 }
  0x95   : > { %v363_v48 = vmul.f32 %v359_v38, %v355_v41  ;;  %v364_v49 = vmul.f32 %v360_v39, %v354_v40  ;;  %v1019_v40 = vld [vmem:[%s1377_s1 + $0x40] sm:$0xff] }
  0x9a   : > { %v227_v26 = vpop.permute.xlu1 %226  ;;  %v206_v27 = vpop.permute.xlu0 %205 }
  0x9b   : > { %v210_v28 = vsel %vm209_vm0, %v204_v20, %v206_v27  ;;  %v211_v29 = vsel %vm209_vm0, %v206_v27, %v204_v20  ;;  %v1012_v20 = vld [vmem:[%s1379_s3 + $0xe] sm:$0x3] }
  0x9c   : > { %v218_v30 = vmul.f32 %v214_v24, %v211_v29  ;;  %v219_v31 = vmul.f32 %v215_v25, %v210_v28  ;;  %v709_v22 = vperm.slane %v1012_v20, 0  ;;  %v710_v23 = vperm.slane %v1012_v20, 1 }
  0x9e   : > { %979 = vmatpush.msk.msra.mxu2 %vm248_vm1, %v218_v30  ;;  %981 = vmatpush.msk.msra.mxu3 %vm248_vm1, %v219_v31  ;;  %v1013_v30 = vld [vmem:[%s1377_s1 + $0x38] sm:$0xff]  ;;  %v1018_v31 = vld [vmem:[%s1379_s3 + $0x10] sm:$0x3] }
  0x9f   : > { %980 = vmatmul.msk.f32.vlgmr.msra.gmra.mxu2 %vm244_vm2, %v220_v32  ;;  %982 = vmatmul.msk.f32.vlgmr.msra.gmra.mxu3 %vm244_vm2, %v220_v32  ;;  %v783_v32 = vperm.slane %v1018_v31, 0  ;;  %v784_v33 = vperm.slane %v1018_v31, 1 }
  0xa2   : > { %v229_v42 = vpop.permute.xlu1 %228  ;;  %v552_v63 = vpop.permute.xlu2 %551 }
  0xa3   : > { %v231_v43 = vsel %vm230_vm4, %v227_v26, %v229_v42  ;;  %v232_v44 = vsel %vm230_vm4, %v229_v42, %v227_v26 }
  0xa4   : > { %v240_v45 = vmul.f32 %v236_v36, %v232_v44  ;;  %v241_v46 = vmul.f32 %v237_v37, %v231_v43 }
  0xa6   : > { %975 = vmatpush.msk.msra.mxu0 %vm248_vm1, %v240_v45  ;;  %977 = vmatpush.msk.msra.mxu1 %vm248_vm1, %v241_v46 }
  0xa7   : > { %976 = vmatmul.msk.f32.vlgmr.msra.gmra.mxu0 %vm244_vm2, %v974_v47  ;;  %978 = vmatmul.msk.f32.vlgmr.msra.gmra.mxu1 %vm244_vm2, %v974_v47 }
  0xa8   : > { %985 = vmatpush.msk.msrb.mxu0 %vm248_vm1, %v363_v48  ;;  %987 = vmatpush.msk.msrb.mxu1 %vm248_vm1, %v364_v49 }
  0xaa   : > { %996 = vmatpush.msk.msra.mxu0 %vm248_vm1, %v1238_v9  ;;  %998 = vmatpush.msk.msra.mxu1 %vm248_vm1, %v1240_v10  ;;  %v426_v53 = vpop.permute.xlu1 %425  ;;  %v424_v54 = vpop.permute.xlu0 %423  ;;  %v1001_v9 = vld [vmem:[%s1377_s1 + $0x28] sm:$0xff] }
  0xab   : > { %v428_v55 = vsel %vm427_vm5, %v424_v54, %v426_v53  ;;  %v429_v56 = vsel %vm427_vm5, %v426_v53, %v424_v54  ;;  %v1006_v10 = vld [vmem:[%s1379_s3 + $0xc] sm:$0x3]  ;;  %v628_v11 = vpop.permute.xlu2 %627 }
  0xac   : > { %v437_v57 = vmul.f32 %v433_v51, %v429_v56  ;;  %v438_v58 = vmul.f32 %v434_v52, %v428_v55  ;;  %v635_v12 = vperm.slane %v1006_v10, 0  ;;  %v636_v13 = vperm.slane %v1006_v10, 1 }
  0xae   : > { %991 = vmatpush.msk.msrb.mxu2 %vm248_vm1, %v437_v57  ;;  %993 = vmatpush.msk.msrb.mxu3 %vm248_vm1, %v438_v58 }
  0xaf   : > { %986 = vmatmul.msk.f32.vlgmr.msrb.gmra.mxu0 %vm244_vm2, %v984_v59  ;;  %988 = vmatmul.msk.f32.vlgmr.msrb.gmra.mxu1 %vm244_vm2, %v984_v59 }
  0xb0   : > { %992 = vmatmul.msk.f32.vlgmr.msrb.gmra.mxu2 %vm244_vm2, %v990_v60  ;;  %994 = vmatmul.msk.f32.vlgmr.msrb.gmra.mxu3 %vm244_vm2, %v990_v60 }
  0xb7   : > { %997 = vmatmul.msk.f32.vlgmr.msra.gmra.mxu0 %vm244_vm2, %v995_v61  ;;  %999 = vmatmul.msk.f32.vlgmr.msra.gmra.mxu1 %vm244_vm2, %v995_v61 }
  0xba   : > { %v554_v4 = vpop.permute.xlu0 %553  ;;  %v774_v34 = vpop.permute.xlu2 %773 }
  0xbb   : > { %v556_v5 = vsel %vm555_vm6, %v552_v63, %v554_v4  ;;  %v557_v6 = vsel %vm555_vm6, %v554_v4, %v552_v63 }
  0xbc   : > { %v565_v7 = vmul.f32 %v561_v1, %v556_v5  ;;  %v566_v8 = vmul.f32 %v562_v2, %v557_v6 }
  0xbe   : > { %1002 = vmatpush.msk.msra.mxu2 %vm248_vm1, %v565_v7  ;;  %1004 = vmatpush.msk.msra.mxu3 %vm248_vm1, %v566_v8 }
  0xbf   : > { %1003 = vmatmul.msk.f32.vlgmr.msra.gmra.mxu2 %vm244_vm2, %v1001_v9  ;;  %1005 = vmatmul.msk.f32.vlgmr.msra.gmra.mxu3 %vm244_vm2, %v1001_v9 }
  0xc2   : > { %v626_v14 = vpop.permute.xlu1 %625 }
  0xc3   : > { %v630_v15 = vsel %vm629_vm7, %v626_v14, %v628_v11  ;;  %v631_v16 = vsel %vm629_vm7, %v628_v11, %v626_v14 }
  0xc4   : > { %v639_v17 = vmul.f32 %v635_v12, %v630_v15  ;;  %v640_v18 = vmul.f32 %v636_v13, %v631_v16 }
  0xc6   : > { %1008 = vmatpush.msk.msrb.mxu0 %vm248_vm1, %v639_v17  ;;  %1010 = vmatpush.msk.msrb.mxu1 %vm248_vm1, %v640_v18  ;;  %v1159_v18 = vmov 256.0  }
  0xc7   : > { %1009 = vmatmul.msk.f32.vlgmr.msrb.gmra.mxu0 %vm244_vm2, %v1007_v19  ;;  %1011 = vmatmul.msk.f32.vlgmr.msrb.gmra.mxu1 %vm244_vm2, %v1007_v19  ;;  %1082 = vrcp.f32 %v1159_v18 }
  0xca   : > { %v702_v24 = vpop.permute.xlu1 %701  ;;  %v700_v25 = vpop.permute.xlu0 %699 }
  0xcb   : > { %v704_v26 = vsel %vm703_vm8, %v700_v25, %v702_v24  ;;  %v705_v27 = vsel %vm703_vm8, %v702_v24, %v700_v25 }
  0xcc   : > { %v713_v28 = vmul.f32 %v709_v22, %v704_v26  ;;  %v714_v29 = vmul.f32 %v710_v23, %v705_v27 }
  0xcd   : > { %v1083_v19 = vpop.eup %1082 }
  0xce   : > { %1014 = vmatpush.msk.msrb.mxu2 %vm248_vm1, %v713_v28  ;;  %1016 = vmatpush.msk.msrb.mxu3 %vm248_vm1, %v714_v29  ;;  %v860_v20 = vmul.f32 256.0, %v1083_v19  ;;  %vm864_vm12 = vweird.f32 %v1083_v19 }
  0xcf   : > { %1015 = vmatmul.msk.f32.vlgmr.msrb.gmra.mxu2 %vm244_vm2, %v1013_v30  ;;  %1017 = vmatmul.msk.f32.vlgmr.msrb.gmra.mxu3 %vm244_vm2, %v1013_v30 }
  0xd0   : > { %v861_v22 = vsub.f32 1.0, %v860_v20 }
  0xd2   : > { %v776_v35 = vpop.permute.xlu0 %775  ;;  %v862_v23 = vmul.f32 %v1083_v19, %v861_v22 }
  0xd3   : > { %v778_v36 = vsel %vm777_vm9, %v774_v34, %v776_v35  ;;  %v779_v37 = vsel %vm777_vm9, %v776_v35, %v774_v34  ;;  %v846_v6 = vpop.permute.xlu1 %845 }
  0xd4   : > { %v787_v38 = vmul.f32 %v783_v32, %v778_v36  ;;  %v788_v39 = vmul.f32 %v784_v33, %v779_v37  ;;  %v863_v24 = vadd.f32 %v1083_v19, %v862_v23 }
  0xd6   : > { %1020 = vmatpush.msk.msra.mxu0 %vm248_vm1, %v787_v38  ;;  %1022 = vmatpush.msk.msra.mxu1 %vm248_vm1, %v788_v39  ;;  %v865_v25 = vsel %vm864_vm12, %v1083_v19, %v863_v24 }
  0xd7   : > { %1021 = vmatmul.msk.f32.vlgmr.msra.gmra.mxu0 %vm244_vm2, %v1019_v40  ;;  %1023 = vmatmul.msk.f32.vlgmr.msra.gmra.mxu1 %vm244_vm2, %v1019_v40 }
 0x122   : > { %v321_v42 = vpop.f32.mrf.mxu2  ;;  %v341_v43 = vpop.f32.mrf.mxu3 }
 0x124   : > { %v272_v21 = vpop.f32.mrf.mxu0  ;;  %v292_v41 = vpop.f32.mrf.mxu1 }
 0x125   : > { %v322_v46 = vadd.f32 %v321_v42, %v272_v21  ;;  %v342_v47 = vadd.f32 %v341_v43, %v292_v41 }
 0x12c   : > { %v393_v44 = vpop.f32.mrf.mxu0  ;;  %v413_v45 = vpop.f32.mrf.mxu1 }
 0x12d   : > { %v416_v50 = vadd.f32 %v393_v44, %v322_v46  ;;  %v417_v51 = vadd.f32 %v413_v45, %v342_v47 }
 0x133   : > { %v467_v48 = vpop.f32.mrf.mxu2  ;;  %v487_v49 = vpop.f32.mrf.mxu3 }
 0x134   : > { %v521_v52 = vpop.f32.mrf.mxu0  ;;  %v541_v53 = vpop.f32.mrf.mxu1  ;;  %v490_v54 = vadd.f32 %v467_v48, %v416_v50  ;;  %v491_v55 = vadd.f32 %v487_v49, %v417_v51 }
 0x136   : > { %v544_v58 = vadd.f32 %v521_v52, %v490_v54  ;;  %v545_v59 = vadd.f32 %v541_v53, %v491_v55 }
 0x142   : > { %v595_v56 = vpop.f32.mrf.mxu2  ;;  %v615_v57 = vpop.f32.mrf.mxu3 }
 0x143   : > { %v618_v62 = vadd.f32 %v595_v56, %v544_v58  ;;  %v619_v63 = vadd.f32 %v615_v57, %v545_v59 }
 0x144   : > { %v669_v60 = vpop.f32.mrf.mxu0  ;;  %v689_v61 = vpop.f32.mrf.mxu1 }
 0x145   : > { %v692_v0 = vadd.f32 %v669_v60, %v618_v62  ;;  %v693_v1 = vadd.f32 %v689_v61, %v619_v63 }
 0x152   : > { %v743_v2 = vpop.f32.mrf.mxu2  ;;  %v763_v3 = vpop.f32.mrf.mxu3 }
 0x153   : > { %v766_v4 = vadd.f32 %v743_v2, %v692_v0  ;;  %v767_v5 = vadd.f32 %v763_v3, %v693_v1 }
 0x154   : > { %v817_v7 = vpop.f32.mrf.mxu0  ;;  %v837_v8 = vpop.f32.mrf.mxu1 }
 0x155   : > { %v840_v9 = vadd.f32 %v817_v7, %v766_v4  ;;  %v841_v10 = vadd.f32 %v837_v8, %v767_v5 }
 0x157   : > { %v848_v11 = vadd.f32 %v846_v6, %v840_v9  ;;  %v849_v12 = vadd.f32 %v846_v6, %v841_v10 }
 0x159   : > { %v852_v13 = vmul.f32 0.01, %v848_v11  ;;  %v853_v14 = vmul.f32 0.01, %v849_v12  ;;  %vm850_vm10 = vcmp.gt.f32.partialorder %v848_v11, 0.0  ;;  %vm851_vm11 = vcmp.gt.f32.partialorder %v849_v12, 0.0 }
 0x15b   : > { %v854_v15 = vsel %vm850_vm10, %v848_v11, %v852_v13  ;;  %v855_v16 = vsel %vm851_vm11, %v849_v12, %v853_v14 }
 0x15c   : > { %v856_v17 = vadd.f32 %v855_v16, %v854_v15 }
 0x15e   : > { %857 = vadd.xlane.f32.xlu2 %v856_v17 }
 0x1d1   : > { %v858_v26 = vpop.xlane.xlu2 %857 }
 0x1d2   : > { %v866_v27 = vmul.f32 %v865_v25, %v858_v26 }
 0x1d4   : > { %v867_v28 = vsub.f32 %v854_v15, %v866_v27  ;;  %v868_v29 = vsub.f32 %v855_v16, %v866_v27 }
 0x1d6   : > { %v869_v30 = vmul.f32 %v867_v28, %v867_v28  ;;  %v870_v31 = vmul.f32 %v868_v29, %v868_v29 }
 0x1d8   : > { %v871_v32 = vadd.f32 %v870_v31, %v869_v30 }
 0x1da   : > { %872 = vadd.xlane.f32.xlu0 %v871_v32 }
 0x24d   : > { %v873_v33 = vpop.xlane.xlu0 %872 }
 0x24e   : > { %v874_v34 = vmul.f32 %v873_v33, %v865_v25 }
 0x250   : > { %v875_v35 = vadd.f32 1e-05, %v874_v34 }
 0x252   : > { %1084 = vrsqrt.f32 %v875_v35  ;;  %vm882_vm14 = vweird.f32 %v875_v35 }
 0x258   : > { %v1085_v36 = vpop.eup %1084 }
 0x259   : > { %v877_v37 = vmul.f32 %v1085_v36, %v875_v35  ;;  %vm883_vm13 = vweird.f32 %v1085_v36 }
 0x25a   : > { %vm884_vm15 = vmor %vm882_vm14, %vm883_vm13 }
 0x25b   : > { %v878_v38 = vmul.f32 %v1085_v36, %v877_v37 }
 0x25d   : > { %v879_v39 = vmul.f32 0.5, %v878_v38 }
 0x25f   : > { %v880_v40 = vsub.f32 1.5, %v879_v39 }
 0x261   : > { %v881_v21 = vmul.f32 %v1085_v36, %v880_v40 }
 0x263   : > { %v885_v41 = vsel %vm884_vm15, %v1085_v36, %v881_v21 }
 0x264   : > { %v886_v42 = vmul.f32 %v885_v41, %v867_v28  ;;  %v887_v43 = vmul.f32 %v885_v41, %v868_v29 }
 0x266   : > { %888 = vst [vmem:[%s190_s5] sm:$0xff] %v886_v42 }
 0x267   : > { %889 = vst [vmem:[%s190_s5 + $0x8] sm:$0xff] %v887_v43 }
 0x268   : > { %1113 = shalt.err (!%p1110_p3)
}
 0x269   : > { %1031 = dma.vmem_to_hbm [thread:$0]  (%p1223_p5), %s905_s6, 256, %s907_s7, %s891_s19  }
 0x26a PF: > { %p1037_p4 = scmp.ge.s32.totalorder %s1148_s18, 2  ;;  %s918_s20 = sand.u32 1, %s1136_s15  }
 0x26b   : > { %s919_s22 = scalar_lea.sflag [#allocation3], %s918_s20 }
 0x26c   : > { %p1034_p7 = pnand %p1037_p4, %p1227_p6 }
 0x26e   : > { %p1035_p8 = pneg %p1034_p7 }
 0x270   : > { %1131 = dma.done.wait (%p1035_p8), %s919_s22, 256  }
 0x271   : > { %1133 = vsyncadd (%p1035_p8), %s919_s22, 4294967040  ;;  %p14_p9 = scmp.ge.s32.totalorder %s1210_s21, 4   ;;  %s1383_s15 = smov %s1140_s16 }
 0x272   : > { %s1384_s16 = smov %s1144_s17  ;;  %s1385_s17 = smov %s1221_s24 }
 0x273   : > { %s1386_s18 = smov %s1210_s21  ;;  %16 = sbr.rel (!%p14_p9) target bundleno = 3 (0x3), region = 86 }
 0x278   :  { %925 = vsyncpa [#allocation3], 1 }
 0x279   :  { %927 = vsyncpa [#allocation3 + $0x1], 1 }

</bundles_post_ra>
